<compile_context>
chip_gen: v6e
topology: v6e:2x2x1
jax: 0.10.0
libtpu: 0.0.40
codegen_flags: <defaults>
</compile_context>

<pallas_src>
import jax
import jax.numpy as jnp
from jax.experimental import pallas as pl
from jax.experimental.pallas import tpu as pltpu

STATE_SIZE = 7 * 7 * 2     # 98  (kept unpadded in HBM; MXU pads internally)
HIDDEN = 64                # logical hidden size of the PyTorch module
HIDDEN_PAD = 128           # zero-padded to a full 128-lane tile
ACTIONS = 3


def actor_kernel(x_ref, w1_ref, b1_ref, w2_ref, b2_ref, w3_ref, b3_ref, o_ref):
    # x tile: (TB, 98). Cast to bf16 on the VMEM tile (weights already bf16) so every
    # matmul is a bf16-native MXU pass; accumulation is f32.
    x = x_ref[...].astype(jnp.bfloat16)

    h1 = jnp.dot(x, w1_ref[...], preferred_element_type=jnp.float32) + b1_ref[...]
    h1 = jnp.maximum(h1, 0.0)                                          # ReLU (f32 VPU)

    h2 = jnp.dot(h1.astype(jnp.bfloat16), w2_ref[...],
                 preferred_element_type=jnp.float32) + b2_ref[...]
    h2 = jnp.maximum(h2, 0.0)                                          # ReLU

    logits = jnp.dot(h2.astype(jnp.bfloat16), w3_ref[...],
                     preferred_element_type=jnp.float32) + b3_ref[...]

    # numerically stable softmax over the action dim
    m = jnp.max(logits, axis=-1, keepdims=True)
    e = jnp.exp(logits - m)
    denom = jnp.sum(e, axis=-1, keepdims=True)
    o_ref[...] = e * pl.reciprocal(denom, approx=True)


def actor_forward(x, params, *, tb=1024):
    """x: (B, ...) flattening to (B, STATE_SIZE). Returns (B, ACTIONS) f32 probabilities."""
    b = x.shape[0]
    x2d = x.reshape(b, -1)          # contiguous row-major -> bitcast, no extra HBM pass
    assert x2d.shape[1] == STATE_SIZE, x2d.shape
    w1, b1, w2, b2, w3, b3 = params

    # batch tile: multiple of 8 (sublane), capped at `tb`
    tile = min(tb, max(8, ((b + 7) // 8) * 8))
    num_tiles = -(-b // tile)
    b_pad = num_tiles * tile
    if b_pad != b:  # tail padding only when needed; softmax is row-wise so pad rows are inert
        x2d = jnp.pad(x2d, ((0, b_pad - b), (0, 0)))

    const = lambda i: (0, 0)   # weights/biases: same block every step -> VMEM resident
    out = pl.pallas_call(
        actor_kernel,
        out_shape=jax.ShapeDtypeStruct((b_pad, ACTIONS), jnp.float32),
        grid=(num_tiles,),
        in_specs=[
            pl.BlockSpec((tile, STATE_SIZE), lambda i: (i, 0)),   # x tile
            pl.BlockSpec(w1.shape, const),
            pl.BlockSpec(b1.shape, const),
            pl.BlockSpec(w2.shape, const),
            pl.BlockSpec(b2.shape, const),
            pl.BlockSpec(w3.shape, const),
            pl.BlockSpec(b3.shape, const),
        ],
        out_specs=pl.BlockSpec((tile, ACTIONS), lambda i: (i, 0)),
        compiler_params=pltpu.CompilerParams(
            dimension_semantics=("parallel",)),                   # megacore split on v7x
    )(x2d, w1, b1, w2, b2, w3, b3)
    return out[:b] if b_pad != b else out


def init_params(key):
    """nn.Linear-style init; weights pre-transposed to (in, out), hidden dim zero-padded
    to 128 lanes (exact), weights stored bf16, biases f32."""
    ks = jax.random.split(key, 6)

    def linear(kw, kb, fan_in, fan_out, pad_in, pad_out):
        bound = 1.0 / (fan_in ** 0.5)
        w = jax.random.uniform(kw, (fan_in, fan_out), jnp.float32, -bound, bound)
        b = jax.random.uniform(kb, (1, fan_out), jnp.float32, -bound, bound)
        w = jnp.pad(w, ((0, pad_in - fan_in), (0, pad_out - fan_out)))
        b = jnp.pad(b, ((0, 0), (0, pad_out - fan_out)))
        return w.astype(jnp.bfloat16), b

    w1, b1 = linear(ks[0], ks[1], STATE_SIZE, HIDDEN, STATE_SIZE, HIDDEN_PAD)
    w2, b2 = linear(ks[2], ks[3], HIDDEN, HIDDEN, HIDDEN_PAD, HIDDEN_PAD)
    w3, b3 = linear(ks[4], ks[5], HIDDEN, ACTIONS, HIDDEN_PAD, ACTIONS)
    return (w1, b1, w2, b2, w3, b3)


def actor_reference(x, params):
    """Pure-JAX f32 reference (same padded params) for a sanity check."""
    w1, b1, w2, b2, w3, b3 = params
    x2d = x.reshape(x.shape[0], -1).astype(jnp.float32)
    h1 = jnp.maximum(x2d @ w1.astype(jnp.float32) + b1, 0.0)
    h2 = jnp.maximum(h1 @ w2.astype(jnp.float32) + b2, 0.0)
    logits = h2 @ w3.astype(jnp.float32) + b3
    return jax.nn.softmax(logits, axis=-1)


if __name__ == "__main__":
    key = jax.random.PRNGKey(0)
    kx, kp = jax.random.split(key)
    params = init_params(kp)

    # Example input consistent with observation_type='pixel': (batch, 2, rows, cols)
    batch = 4
    x = jax.random.normal(kx, (batch, 2, 7, 7), dtype=jnp.float32)

    probs = actor_forward(x, params)
    probs = jax.block_until_ready(probs)

    assert probs.shape == (batch, ACTIONS)
    # rows sum to ~1 (approx reciprocal + bf16 dots -> loose tolerance)
    row_sums = jnp.sum(probs, axis=-1)
    assert bool(jnp.all(jnp.abs(row_sums - 1.0) < 5e-3)), row_sums
    # matches the f32 reference within bf16 tolerance
    ref = actor_reference(x, params)
    assert bool(jnp.all(jnp.abs(probs - ref) < 5e-2))
    print("KERNEL_OK")
</pallas_src>

<mosaic_0001>
module attributes {stable_mosaic.version = 11 : i64} {
  func.func @actor_kernel(%arg0: i32, %arg1: memref<8x98xf32, #tpu.memory_space<vmem>>, %arg2: memref<98x128xbf16, #tpu.memory_space<vmem>>, %arg3: memref<1x128xf32, #tpu.memory_space<vmem>>, %arg4: memref<128x128xbf16, #tpu.memory_space<vmem>>, %arg5: memref<1x128xf32, #tpu.memory_space<vmem>>, %arg6: memref<128x3xbf16, #tpu.memory_space<vmem>>, %arg7: memref<1x3xf32, #tpu.memory_space<vmem>>, %arg8: memref<8x3xf32, #tpu.memory_space<vmem>>) attributes {dimension_semantics = [#tpu.dimension_semantics<parallel>], iteration_bounds = array<i64: 1>, scalar_prefetch = 0 : i64, scratch_operands = 0 : i64, tpu.core_type = #tpu.core_type<tc>, window_params = [{transform_indices = @transform_0, window_bounds = array<i64: 8, 98>}, {pipeline_mode = #tpu.pipeline_mode<synchronous>, transform_indices = @transform_1, window_bounds = array<i64: 98, 128>}, {pipeline_mode = #tpu.pipeline_mode<synchronous>, transform_indices = @transform_2, window_bounds = array<i64: 1, 128>}, {pipeline_mode = #tpu.pipeline_mode<synchronous>, transform_indices = @transform_3, window_bounds = array<i64: 128, 128>}, {pipeline_mode = #tpu.pipeline_mode<synchronous>, transform_indices = @transform_4, window_bounds = array<i64: 1, 128>}, {pipeline_mode = #tpu.pipeline_mode<synchronous>, transform_indices = @transform_5, window_bounds = array<i64: 128, 3>}, {pipeline_mode = #tpu.pipeline_mode<synchronous>, transform_indices = @transform_6, window_bounds = array<i64: 1, 3>}, {transform_indices = @transform_7, window_bounds = array<i64: 8, 3>}]} {
    %c0 = arith.constant 0 : index
    %c0_0 = arith.constant 0 : index
    %0 = vector.load %arg1[%c0, %c0_0] : memref<8x98xf32, #tpu.memory_space<vmem>>, vector<8x98xf32>
    %1 = arith.truncf %0 : vector<8x98xf32> to vector<8x98xbf16>
    %c0_1 = arith.constant 0 : index
    %c0_2 = arith.constant 0 : index
    %2 = vector.load %arg2[%c0_1, %c0_2] : memref<98x128xbf16, #tpu.memory_space<vmem>>, vector<98x128xbf16>
    %cst = arith.constant dense<0.000000e+00> : vector<8x128xf32>
    %3 = tpu.matmul %1, %2, %cst {dimension_numbers = #tpu.dot_dimension_numbers<[1], [0], [0], [1], [0, 0, 1, 1], [], []>} : vector<8x98xbf16>, vector<98x128xbf16>, vector<8x128xf32> -> vector<8x128xf32>
    %c0_3 = arith.constant 0 : index
    %c0_4 = arith.constant 0 : index
    %4 = vector.load %arg3[%c0_3, %c0_4] : memref<1x128xf32, #tpu.memory_space<vmem>>, vector<1x128xf32>
    %5 = vector.broadcast %4 : vector<1x128xf32> to vector<8x128xf32>
    %6 = arith.addf %3, %5 : vector<8x128xf32>
    %cst_5 = arith.constant 0.000000e+00 : f32
    %7 = vector.broadcast %cst_5 : f32 to vector<8x128xf32>
    %8 = arith.maximumf %6, %7 : vector<8x128xf32>
    %9 = arith.truncf %8 : vector<8x128xf32> to vector<8x128xbf16>
    %c0_6 = arith.constant 0 : index
    %c0_7 = arith.constant 0 : index
    %10 = vector.load %arg4[%c0_6, %c0_7] : memref<128x128xbf16, #tpu.memory_space<vmem>>, vector<128x128xbf16>
    %cst_8 = arith.constant dense<0.000000e+00> : vector<8x128xf32>
    %11 = tpu.matmul %9, %10, %cst_8 {dimension_numbers = #tpu.dot_dimension_numbers<[1], [0], [0], [1], [0, 0, 1, 1], [], []>} : vector<8x128xbf16>, vector<128x128xbf16>, vector<8x128xf32> -> vector<8x128xf32>
    %c0_9 = arith.constant 0 : index
    %c0_10 = arith.constant 0 : index
    %12 = vector.load %arg5[%c0_9, %c0_10] : memref<1x128xf32, #tpu.memory_space<vmem>>, vector<1x128xf32>
    %13 = vector.broadcast %12 : vector<1x128xf32> to vector<8x128xf32>
    %14 = arith.addf %11, %13 : vector<8x128xf32>
    %cst_11 = arith.constant 0.000000e+00 : f32
    %15 = vector.broadcast %cst_11 : f32 to vector<8x128xf32>
    %16 = arith.maximumf %14, %15 : vector<8x128xf32>
    %17 = arith.truncf %16 : vector<8x128xf32> to vector<8x128xbf16>
    %c0_12 = arith.constant 0 : index
    %c0_13 = arith.constant 0 : index
    %18 = vector.load %arg6[%c0_12, %c0_13] : memref<128x3xbf16, #tpu.memory_space<vmem>>, vector<128x3xbf16>
    %cst_14 = arith.constant dense<0.000000e+00> : vector<8x3xf32>
    %19 = tpu.matmul %17, %18, %cst_14 {dimension_numbers = #tpu.dot_dimension_numbers<[1], [0], [0], [1], [0, 0, 1, 1], [], []>} : vector<8x128xbf16>, vector<128x3xbf16>, vector<8x3xf32> -> vector<8x3xf32>
    %c0_15 = arith.constant 0 : index
    %c0_16 = arith.constant 0 : index
    %20 = vector.load %arg7[%c0_15, %c0_16] : memref<1x3xf32, #tpu.memory_space<vmem>>, vector<1x3xf32>
    %21 = vector.broadcast %20 : vector<1x3xf32> to vector<8x3xf32>
    %22 = arith.addf %19, %21 : vector<8x3xf32>
    %cst_17 = arith.constant dense<0xFF800000> : vector<8xf32>
    %23 = vector.multi_reduction <maximumf>, %22, %cst_17 [1] : vector<8x3xf32> to vector<8xf32>
    %24 = vector.shape_cast %23 : vector<8xf32> to vector<8x1xf32>
    %25 = vector.broadcast %24 : vector<8x1xf32> to vector<8x3xf32>
    %26 = arith.subf %22, %25 : vector<8x3xf32>
    %27 = math.exp %26 : vector<8x3xf32>
    %cst_18 = arith.constant dense<0.000000e+00> : vector<8xf32>
    %28 = vector.multi_reduction <add>, %27, %cst_18 [1] : vector<8x3xf32> to vector<8xf32>
    %29 = vector.shape_cast %28 : vector<8xf32> to vector<8x1xf32>
    %30 = tpu.reciprocal %29 {approx = true} : vector<8x1xf32> -> vector<8x1xf32>
    %31 = vector.broadcast %30 : vector<8x1xf32> to vector<8x3xf32>
    %32 = arith.mulf %27, %31 : vector<8x3xf32>
    %c0_19 = arith.constant 0 : index
    %c0_20 = arith.constant 0 : index
    %33 = vector.load %arg8[%c0_19, %c0_20] : memref<8x3xf32, #tpu.memory_space<vmem>>, vector<8x3xf32>
    tpu.vector_store %arg8[%c0_19, %c0_20], %32 {strides = array<i32>} : memref<8x3xf32, #tpu.memory_space<vmem>>, vector<8x3xf32>,
    return
  }
  func.func @transform_0(%arg0: i32) -> (i32, i32) {
    %c0_i32 = arith.constant 0 : i32
    %c0_i32_0 = arith.constant 0 : i32
    return %arg0, %c0_i32 : i32, i32
  }
  func.func @transform_1(%arg0: i32) -> (i32, i32) {
    %c0_i32 = arith.constant 0 : i32
    %c0_i32_0 = arith.constant 0 : i32
    %c0_i32_1 = arith.constant 0 : i32
    return %c0_i32, %c0_i32_0 : i32, i32
  }
  func.func @transform_2(%arg0: i32) -> (i32, i32) {
    %c0_i32 = arith.constant 0 : i32
    %c0_i32_0 = arith.constant 0 : i32
    %c0_i32_1 = arith.constant 0 : i32
    return %c0_i32, %c0_i32_0 : i32, i32
  }
  func.func @transform_3(%arg0: i32) -> (i32, i32) {
    %c0_i32 = arith.constant 0 : i32
    %c0_i32_0 = arith.constant 0 : i32
    %c0_i32_1 = arith.constant 0 : i32
    return %c0_i32, %c0_i32_0 : i32, i32
  }
  func.func @transform_4(%arg0: i32) -> (i32, i32) {
    %c0_i32 = arith.constant 0 : i32
    %c0_i32_0 = arith.constant 0 : i32
    %c0_i32_1 = arith.constant 0 : i32
    return %c0_i32, %c0_i32_0 : i32, i32
  }
  func.func @transform_5(%arg0: i32) -> (i32, i32) {
    %c0_i32 = arith.constant 0 : i32
    %c0_i32_0 = arith.constant 0 : i32
    %c0_i32_1 = arith.constant 0 : i32
    return %c0_i32, %c0_i32_0 : i32, i32
  }
  func.func @transform_6(%arg0: i32) -> (i32, i32) {
    %c0_i32 = arith.constant 0 : i32
    %c0_i32_0 = arith.constant 0 : i32
    %c0_i32_1 = arith.constant 0 : i32
    return %c0_i32, %c0_i32_0 : i32, i32
  }
  func.func @transform_7(%arg0: i32) -> (i32, i32) {
    %c0_i32 = arith.constant 0 : i32
    %c0_i32_0 = arith.constant 0 : i32
    return %arg0, %c0_i32 : i32, i32
  }
}

</mosaic_0001>

<bundles_post_ra>
// kernel: tpu_custom_call.1
= control target key start
LH: loop header
LB: loop body
LE: loop exit
PB: predicated region body
PF: predicated region fallthrough
CT: control target
= control target key end

     0   :  { %12 = vsyncpa [#allocation3], 0  ;;  %s739_s0 = inlined_call_operand.hbm [shape: f32[8,98], index: 0, kind: input, shape index: {}]   ;;  %s740_s1 = inlined_call_operand.hbm [shape: bf16[98,128], index: 1, kind: input, shape index: {}]   ;;  %s741_s2 = inlined_call_operand.vmem [shape: f32[1,128], index: 2, kind: input, shape index: {}]   ;;  %s742_s3 = inlined_call_operand.vmem [shape: bf16[128,128], index: 3, kind: input, shape index: {}]   ;;  %s743_s4 = inlined_call_operand.vmem [shape: f32[1,128], index: 4, kind: input, shape index: {}]   ;;  %s744_s5 = inlined_call_operand.vmem [shape: bf16[128,3], index: 5, kind: input, shape index: {}]   ;;  %s745_s6 = inlined_call_operand.vmem [shape: f32[1,3], index: 6, kind: input, shape index: {}]   ;;  %s746_s7 = inlined_call_operand.vmem [shape: f32[8,3], index: 7, kind: output, shape index: {}]  }
   0x1   :  { %13 = vsyncpa [#allocation5], 0  ;;  %s595_s24 = smov [#allocation2]   ;;  %s596_s26 = smov [#allocation4]  }
   0x2   :  { %s20_s25 = sshll.u32 %s595_s24, 4  ;;  %s29_s27 = sshll.u32 %s596_s26, 4  ;;  %s21_s25 = int_to_ptr.vmem [resolvable:$true] %s20_s25  ;;  %s30_s27 = int_to_ptr.vmem [resolvable:$true] %s29_s27 }
   0x3   :  { %s559_s28 = scalar_lea.vmem %s21_s25, 128  ;;  %p564_p1 = scmp.lt.s32.totalorder %s21_s25, %s21_s25 }
   0x4   :  { %p560_p0 = scmp.ne.s32.totalorder %s21_s25, %s559_s28  ;;  %p565_p2 = scmp.lt.s32.totalorder %s559_s28, %s559_s28 }
   0x6   :  { %p566_p3 = por %p565_p2, %p564_p1 }
   0x8   :  { %p567_p4 = pnand %p566_p3, %p560_p0 }
   0xa   :  { %570 = shalt.err (!%p567_p4)
}
   0xb   :  { %23 = dma.hbm_to_vmem [thread:$0]  %s739_s0, 128, %s21_s25, [#allocation3]  }
   0xc   :  { %s579_s8 = scalar_lea.vmem %s30_s27, 832  ;;  %p584_p6 = scmp.lt.s32.totalorder %s30_s27, %s30_s27 }
   0xd   :  { %p580_p5 = scmp.ne.s32.totalorder %s30_s27, %s579_s8  ;;  %p585_p7 = scmp.lt.s32.totalorder %s579_s8, %s579_s8 }
   0xf   :  { %p586_p8 = por %p585_p7, %p584_p6 }
  0x11   :  { %p587_p9 = pnand %p586_p8, %p580_p5 }
  0x13   :  { %590 = shalt.err (!%p587_p9)
}
  0x14   :  { %s597_s9 = smov 64   ;;  %s598_s10 = smov 4  }
  0x15   :  { %35 = dma.hbm_to_vmem [thread:$0]  %s740_s1, 832, %s30_s27, [#allocation5], %s597_s9, %s597_s9, %s598_s10  }
  0x16   :  { %591 = dma.done.wait [#allocation3], 128  }
  0x17   :  { %592 = vsyncadd [#allocation3], 4294967168 }
  0x18   :  { %593 = dma.done.wait [#allocation5], 832  }
  0x19   :  { %594 = vsyncadd [#allocation5], 4294966464  ;;  %v599_v0 = vmov 0.0   ;;  %vm600_vm0 = vmmov 0   ;;  %vm118_vm1 = vcmask 1040384   ;;  %v525_v3 = vld [vmem:[#allocation4 + $0x28] sm:$0xff]  }
  0x1a   :  { %460 = vmatprep.subr.bf16.mxu0 %v599_v0  ;;  %474 = vmatprep.mubr.msk.bf16.mxu0 %vm600_vm0, %v599_v0  ;;  %v524_v1 = vld [vmem:[#allocation4 + $0x30] ss:$0 sps:$4 sm:$0x11]   ;;  %v526_v4 = vld [vmem:[#allocation4 + $0x20] sm:$0xff]   ;;  %v532_v6 = vld [vmem:[%s742_s3 + $0x30] sm:$0xff]   ;;  %vm114_vm2 = vcmask 801792  }
  0x1b   :  { %478 = vmatprep.subr.bf16.mxu1 %v599_v0  ;;  %494 = vmatprep.mubr.msk.bf16.mxu1 %vm600_vm0, %v599_v0  ;;  %v120_v2 = vsel %vm118_vm1, %v524_v1, 0  ;;  %v531_v5 = vld [vmem:[%s742_s3 + $0x38] sm:$0xff]   ;;  %v527_v7 = vld [vmem:[#allocation4 + $0x18] sm:$0xff]   ;;  %v533_v9 = vld [vmem:[%s742_s3 + $0x28] sm:$0xff]   ;;  %vm388_vm3 = vcmask 23552  }
  0x1c   :  { %461 = vmatpush3.bf16.msra.mxu0 %v120_v2  ;;  %479 = vmatpush3.bf16.msra.mxu1 %v531_v5  ;;  %v528_v8 = vld [vmem:[#allocation4 + $0x10] sm:$0xff]   ;;  %v534_v10 = vld [vmem:[%s742_s3 + $0x20] sm:$0xff]   ;;  %v529_v11 = vld [vmem:[#allocation4 + $0x8] sm:$0xff]  }
  0x1d   :  { %462 = vmatprep.subr.bf16.mxu0 %v599_v0  ;;  %480 = vmatprep.subr.bf16.mxu1 %v599_v0  ;;  %v535_v12 = vld [vmem:[%s742_s3 + $0x18] sm:$0xff]   ;;  %v530_v13 = vld [vmem:[#allocation4] sm:$0xff]   ;;  %v53_v14 = vld [vmem:[#allocation2] sm:$0xff] }
  0x1e   :  { %v536_v15 = vld [vmem:[%s742_s3 + $0x10] sm:$0xff]   ;;  %v54_v16 = vpack.c.bf16 %v53_v14, %v53_v14  ;;  %v537_v17 = vld [vmem:[%s742_s3 + $0x8] sm:$0xff]   ;;  %v538_v18 = vld [vmem:[%s742_s3] sm:$0xff]  }
  0x1f   :  { %v539_v19 = vld [vmem:[%s744_s5 + $0x38] sm:$0xff]   ;;  %v540_v20 = vld [vmem:[%s744_s5 + $0x30] sm:$0xff]   ;;  %v541_v21 = vld [vmem:[%s744_s5 + $0x28] sm:$0xff]  }
  0x20   :  { %463 = vmatpush3.bf16.msra.mxu0 %v525_v3  ;;  %481 = vmatpush3.bf16.msra.mxu1 %v532_v6  ;;  %v542_v22 = vld [vmem:[%s744_s5 + $0x20] sm:$0xff]   ;;  %v543_v23 = vld [vmem:[%s744_s5 + $0x18] sm:$0xff]   ;;  %v544_v24 = vld [vmem:[%s744_s5 + $0x10] sm:$0xff]  }
  0x21   :  { %464 = vmatprep.subr.bf16.mxu0 %v599_v0  ;;  %482 = vmatprep.subr.bf16.mxu1 %v599_v0  ;;  %v407_v25 = vld [vmem:[%s741_s2] ss:$0 sm:$0xff]  ;;  %v545_v33 = vld [vmem:[%s744_s5 + $0x8] sm:$0xff]  }
  0x22   :  { %v546_v34 = vld [vmem:[%s744_s5] sm:$0xff]  }
  0x23   :  { %v416_v35 = vld [vmem:[%s743_s4] ss:$0 sm:$0xff] }
  0x24   :  { %465 = vmatpush3.bf16.msra.mxu0 %v526_v4  ;;  %483 = vmatpush3.bf16.msra.mxu1 %v533_v9  ;;  %v425_v43 = vld [vmem:[%s745_s6] ss:$0 sm:$0xff] }
  0x25   :  { %466 = vmatprep.subr.bf16.mxu0 %v599_v0  ;;  %484 = vmatprep.subr.bf16.mxu1 %v599_v0 }
  0x28   :  { %467 = vmatpush3.bf16.msra.mxu0 %v527_v7  ;;  %485 = vmatpush3.bf16.msra.mxu1 %v534_v10 }
  0x29   :  { %468 = vmatprep.subr.bf16.mxu0 %v599_v0  ;;  %486 = vmatprep.subr.bf16.mxu1 %v599_v0 }
  0x2c   :  { %469 = vmatpush3.bf16.msra.mxu0 %v528_v8  ;;  %487 = vmatpush3.bf16.msra.mxu1 %v535_v12 }
  0x2d   :  { %470 = vmatprep.subr.bf16.mxu0 %v599_v0  ;;  %488 = vmatprep.subr.bf16.mxu1 %v599_v0 }
  0x30   :  { %471 = vmatpush3.bf16.msra.mxu0 %v529_v11  ;;  %489 = vmatpush3.bf16.msra.mxu1 %v536_v15 }
  0x31   :  { %472 = vmatprep.subr.bf16.mxu0 %v599_v0  ;;  %490 = vmatprep.subr.bf16.mxu1 %v599_v0 }
  0x34   :  { %473 = vmatpush3.bf16.msra.mxu0 %v530_v13  ;;  %491 = vmatpush3.bf16.msra.mxu1 %v537_v17 }
  0x35   :  { %498 = vmatprep.subr.bf16.mxu0 %v599_v0  ;;  %492 = vmatprep.subr.bf16.mxu1 %v599_v0 }
  0x37   :  { %475 = vmatmul.mubr.msk.bf16.vlgmr.msra.gmra.mxu0 %vm114_vm2, %v54_v16 }
  0x38   :  { %514 = vmatprep.mubr.msk.bf16.mxu0 %vm600_vm0, %v599_v0  ;;  %493 = vmatpush3.bf16.msra.mxu1 %v538_v18 }
  0x39   :  { %499 = vmatpush3.bf16.msra.mxu0 %v539_v19 }
  0x3a   :  { %500 = vmatprep.subr.bf16.mxu0 %v599_v0 }
  0x3d   :  { %501 = vmatpush3.bf16.msra.mxu0 %v540_v20 }
  0x3e   :  { %502 = vmatprep.subr.bf16.mxu0 %v599_v0 }
  0x41   :  { %503 = vmatpush3.bf16.msra.mxu0 %v541_v21 }
  0x42   :  { %504 = vmatprep.subr.bf16.mxu0 %v599_v0 }
  0x45   :  { %505 = vmatpush3.bf16.msra.mxu0 %v542_v22 }
  0x46   :  { %506 = vmatprep.subr.bf16.mxu0 %v599_v0 }
  0x49   :  { %507 = vmatpush3.bf16.msra.mxu0 %v543_v23 }
  0x4a   :  { %508 = vmatprep.subr.bf16.mxu0 %v599_v0 }
  0x4d   :  { %509 = vmatpush3.bf16.msra.mxu0 %v544_v24 }
  0x4e   :  { %510 = vmatprep.subr.bf16.mxu0 %v599_v0 }
  0x51   :  { %511 = vmatpush3.bf16.msra.mxu0 %v545_v33 }
  0x52   :  { %512 = vmatprep.subr.bf16.mxu0 %v599_v0 }
  0x55   :  { %513 = vmatpush3.bf16.msra.mxu0 %v546_v34 }
  0xf7   :  { %v156_v26 = vpop.f32.mrf.mxu0 }
  0xf8   :  { %v157_v27 = vadd.f32 %v407_v25, %v156_v26 }
  0xf9   :  { %v476_v28 = vpop.f32.mrf.mxu0 }
  0xfa   :  { %v162_v29 = vmax.f32 %v157_v27, 0.0 }
  0xfb   :  { %v159_v30 = vpop.f32.mrf.mxu0 }
  0xfc   :  { %v163_v31 = vpack.c.bf16 %v162_v29, %v162_v29 }
  0xfd   :  { %v477_v32 = vpop.f32.mrf.mxu0 }
  0xfe   :  { %495 = vmatmul.mubr.bf16.vlgmr.msra.gmra.mxu1 %v163_v31 }
 0x1be   :  { %v269_v36 = vpop.f32.mrf.mxu1 }
 0x1bf   :  { %v270_v37 = vadd.f32 %v416_v35, %v269_v36 }
 0x1c0   :  { %v496_v38 = vpop.f32.mrf.mxu1 }
 0x1c1   :  { %v275_v39 = vmax.f32 %v270_v37, 0.0 }
 0x1c2   :  { %v272_v40 = vpop.f32.mrf.mxu1 }
 0x1c3   :  { %v276_v41 = vpack.c.bf16 %v275_v39, %v275_v39 }
 0x1c4   :  { %v497_v42 = vpop.f32.mrf.mxu1 }
 0x1c5   :  { %515 = vmatmul.mubr.bf16.vlgmr.msra.gmra.mxu0 %v276_v41 }
 0x285   :  { %v382_v44 = vpop.f32.mrf.mxu0 }
 0x286   :  { %v383_v45 = vadd.f32 %v425_v43, %v382_v44 }
 0x287   :  { %v516_v46 = vpop.f32.mrf.mxu0 }
 0x288   :  { %v389_v47 = vsel %vm388_vm3, %v383_v45, -inf }
 0x289   :  { %390 = vmax.xlane.f32.xlu0 %v389_v47  ;;  %v385_v48 = vpop.f32.mrf.mxu0 }
 0x28b   :  { %v517_v49 = vpop.f32.mrf.mxu0 }
 0x312   :  { %v391_v50 = vpop.xlane.xlu0 %390 }
 0x313   :  { %v392_v51 = vsub.f32 %v383_v45, %v391_v50 }
 0x315   :  { %v393_v52 = vmul.f32 1.442695, %v392_v51 }
 0x317   :  { %547 = vpow2.f32 %v393_v52 }
 0x324   :  { %v548_v53 = vpop.eup %547 }
 0x325   :  { %v395_v54 = vsel %vm388_vm3, %v548_v53, 0.0 }
 0x326   :  { %396 = vadd.xlane.f32.xlu0 %v395_v54 }
 0x3af   :  { %v397_v55 = vpop.xlane.xlu0 %396 }
 0x3b0   :  { %549 = vrcp.f32 %v397_v55 }
 0x3bd   :  { %v550_v56 = vpop.eup %549 }
 0x3be   :  { %v399_v57 = vmul.f32 %v550_v56, %v548_v53 }
 0x3c0   :  { %400 = vst.msk [vmem:[%s746_s7] sm:$0xff] %vm388_vm3, %v399_v57 }
 0x3c1   :  { %405 = vsyncpa [#allocation3], 1 }
 0x3c2   :  { %406 = vsyncpa [#allocation5], 1 }

</bundles_post_ra>
